<compile_context>
chip_gen: v5e
topology: v5e:2x2
jax: 0.10.0
libtpu: 0.0.40
codegen_flags: <defaults>
</compile_context>

<pallas_src>
import jax
import jax.numpy as jnp
from jax.experimental import pallas as pl
from jax.experimental.pallas import tpu as pltpu

# 128 * 64 * 256 * 4 B = 8 MiB per x tile; x2 (double buffer) = 16 MiB, which
# fits v7x's 32 MiB scoped-VMEM default (and easily fits v5e/v6e).
_MAX_BATCH_TILE = 128


def _classifier_kernel(x_ref, ws_ref, bs_ref, wh_ref, bh_ref, o_ref):
    """One batch tile, fully resident in VMEM.

    x_ref : (TB, C, H*W) f32   image tile, spatial flattened
    ws_ref: (C, 1000)    bf16  stem (backbone stand-in) weight
    bs_ref: (1, 1000)    f32   stem bias
    wh_ref: (1000, NCp)  bf16  folded head weight (fc @ fc2), lane-padded
    bh_ref: (1, NCp)     f32   folded head bias, lane-padded
    o_ref : (TB, NCp)    f32   padded logits (real logits in first NC lanes)
    """
    # ---- backbone stand-in: global average pool (lane reduction) + linear ----
    pooled = jnp.mean(x_ref[...], axis=-1)                       # (TB, C) f32
    feat = jnp.dot(pooled.astype(jnp.bfloat16), ws_ref[...],
                   preferred_element_type=jnp.float32) + bs_ref[...]
    feat = jnp.maximum(feat, 0.0)                                # (TB, 1000)

    # ---- head: fc -> dropout(eval: identity) -> fc2, folded to one matmul ----
    logits = jnp.dot(feat.astype(jnp.bfloat16), wh_ref[...],
                     preferred_element_type=jnp.float32) + bh_ref[...]
    o_ref[...] = logits.astype(o_ref.dtype)


def fold_head_params(params):
    """One-time inference prep: fold fc->fc2, lane-pad, cast weights to bf16."""
    w_head = params["w_fc"] @ params["w_fc2"]                    # (1000, NC) f32
    b_head = params["b_fc"] @ params["w_fc2"] + params["b_fc2"]  # (NC,) f32
    nc = w_head.shape[1]
    nc_pad = max(128, ((nc + 127) // 128) * 128)                 # lane-dense out
    w_head_p = jnp.zeros((w_head.shape[0], nc_pad), jnp.float32)
    w_head_p = w_head_p.at[:, :nc].set(w_head)
    b_head_p = jnp.zeros((nc_pad,), jnp.float32).at[:nc].set(b_head)
    return dict(
        w_stem=params["w_stem"].astype(jnp.bfloat16),
        b_stem=params["b_stem"].reshape(1, -1).astype(jnp.float32),
        w_head=w_head_p.astype(jnp.bfloat16),
        b_head=b_head_p.reshape(1, -1).astype(jnp.float32),
        num_classes=nc,
    )


def classifier_forward(x, iparams):
    """x: (B, C, H, W) f32 NCHW image. iparams: output of fold_head_params.

    Returns (B, num_classes) f32 logits.
    """
    B, C, H, W = x.shape
    HW = H * W
    x3 = x.reshape(B, C, HW)  # glue reshape (spatial flatten), HW on lane axis

    ws, bs = iparams["w_stem"], iparams["b_stem"]
    wh, bh = iparams["w_head"], iparams["b_head"]
    nc = iparams["num_classes"]
    nc_pad = wh.shape[1]

    # Batch tiling: small batches run in a single grid step; large batches are
    # tiled so the x tile double-buffers against compute and the (tiny,
    # resident) weights are loaded once per call instead of per image.
    tb = B if B <= _MAX_BATCH_TILE else _MAX_BATCH_TILE
    n_tiles = pl.cdiv(B, tb)
    bp = n_tiles * tb
    if bp != B:
        x3 = jnp.pad(x3, ((0, bp - B), (0, 0), (0, 0)))

    def resident(arr):
        # Constant block index -> Pallas keeps the buffer resident across grid.
        return pl.BlockSpec(arr.shape, lambda i: (0,) * arr.ndim)

    out = pl.pallas_call(
        _classifier_kernel,
        out_shape=jax.ShapeDtypeStruct((bp, nc_pad), jnp.float32),
        grid=(n_tiles,),
        in_specs=[
            pl.BlockSpec((tb, C, HW), lambda i: (i, 0, 0)),
            resident(ws),
            resident(bs),
            resident(wh),
            resident(bh),
        ],
        out_specs=pl.BlockSpec((tb, nc_pad), lambda i: (i, 0)),
        compiler_params=pltpu.CompilerParams(
            dimension_semantics=("parallel",)),   # shard batch across TCs (v7x)
    )(x3, ws, bs, wh, bh)

    return out[:B, :nc]


def init_params(key, in_channels=64, num_classes=2):
    """Deterministic parameter init (shapes from the module's __init__)."""
    k = jax.random.split(key, 6)

    def lin(kw, kb, fan_in, fan_out):
        bound = 1.0 / jnp.sqrt(fan_in)
        w = jax.random.uniform(kw, (fan_in, fan_out), jnp.float32,
                               -bound, bound)
        b = jax.random.uniform(kb, (fan_out,), jnp.float32, -bound, bound)
        return w, b

    w_stem, b_stem = lin(k[0], k[1], in_channels, 1000)   # backbone stub
    w_fc, b_fc = lin(k[2], k[3], 1000, 512)               # nn.Linear(1000, 512)
    w_fc2, b_fc2 = lin(k[4], k[5], 512, num_classes)      # nn.Linear(512, 2)
    return dict(w_stem=w_stem, b_stem=b_stem,
                w_fc=w_fc, b_fc=b_fc,
                w_fc2=w_fc2, b_fc2=b_fc2)


def reference_forward(x, params):
    """Pure-JAX f32 reference of the module semantics (unfolded head)."""
    B, C, H, W = x.shape
    pooled = x.reshape(B, C, H * W).mean(-1)
    feat = jnp.maximum(pooled @ params["w_stem"] + params["b_stem"], 0.0)
    h = feat @ params["w_fc"] + params["b_fc"]        # fc
    # dropout p=0.2: identity in eval mode
    return h @ params["w_fc2"] + params["b_fc2"]      # fc2


if __name__ == "__main__":
    key = jax.random.PRNGKey(0)
    kx, kp = jax.random.split(key)

    # Small image consistent with the module: batch=2, in_channels=64, 16x16.
    x = jax.random.normal(kx, (2, 64, 16, 16), jnp.float32)
    params = init_params(kp, in_channels=64, num_classes=2)
    iparams = fold_head_params(params)   # one-time fold + bf16 cast

    out = classifier_forward(x, iparams)
    out = jax.block_until_ready(out)

    ref = reference_forward(x, params)
    assert out.shape == (2, 2)
    # bf16 weights/activations in the matmuls (f32 accumulation) -> compare to
    # the f32 reference with bf16-appropriate tolerance.
    assert jnp.allclose(out, ref, atol=1e-2, rtol=5e-2), "mismatch vs reference"
    print("KERNEL_OK")
</pallas_src>

<mosaic_0001>
module attributes {stable_mosaic.version = 11 : i64} {
  func.func @_classifier_kernel(%arg0: i32, %arg1: memref<2x64x256xf32, #tpu.memory_space<vmem>>, %arg2: memref<64x1000xbf16, #tpu.memory_space<vmem>>, %arg3: memref<1x1000xf32, #tpu.memory_space<vmem>>, %arg4: memref<1000x128xbf16, #tpu.memory_space<vmem>>, %arg5: memref<1x128xf32, #tpu.memory_space<vmem>>, %arg6: memref<2x128xf32, #tpu.memory_space<vmem>>) attributes {dimension_semantics = [#tpu.dimension_semantics<parallel>], iteration_bounds = array<i64: 1>, scalar_prefetch = 0 : i64, scratch_operands = 0 : i64, tpu.core_type = #tpu.core_type<tc>, window_params = [{transform_indices = @transform_0, window_bounds = array<i64: 2, 64, 256>}, {pipeline_mode = #tpu.pipeline_mode<synchronous>, transform_indices = @transform_1, window_bounds = array<i64: 64, 1000>}, {pipeline_mode = #tpu.pipeline_mode<synchronous>, transform_indices = @transform_2, window_bounds = array<i64: 1, 1000>}, {pipeline_mode = #tpu.pipeline_mode<synchronous>, transform_indices = @transform_3, window_bounds = array<i64: 1000, 128>}, {pipeline_mode = #tpu.pipeline_mode<synchronous>, transform_indices = @transform_4, window_bounds = array<i64: 1, 128>}, {transform_indices = @transform_5, window_bounds = array<i64: 2, 128>}]} {
    %c0 = arith.constant 0 : index
    %c0_0 = arith.constant 0 : index
    %c0_1 = arith.constant 0 : index
    %0 = vector.load %arg1[%c0, %c0_0, %c0_1] : memref<2x64x256xf32, #tpu.memory_space<vmem>>, vector<2x64x256xf32>
    %cst = arith.constant dense<0.000000e+00> : vector<2x64xf32>
    %1 = vector.multi_reduction <add>, %0, %cst [2] : vector<2x64x256xf32> to vector<2x64xf32>
    %cst_2 = arith.constant 2.560000e+02 : f32
    %2 = vector.broadcast %cst_2 : f32 to vector<2x64xf32>
    %3 = arith.divf %1, %2 : vector<2x64xf32>
    %4 = arith.truncf %3 : vector<2x64xf32> to vector<2x64xbf16>
    %c0_3 = arith.constant 0 : index
    %c0_4 = arith.constant 0 : index
    %5 = vector.load %arg2[%c0_3, %c0_4] : memref<64x1000xbf16, #tpu.memory_space<vmem>>, vector<64x1000xbf16>
    %cst_5 = arith.constant dense<0.000000e+00> : vector<2x1000xf32>
    %6 = tpu.matmul %4, %5, %cst_5 {dimension_numbers = #tpu.dot_dimension_numbers<[1], [0], [0], [1], [0, 0, 1, 1], [], []>} : vector<2x64xbf16>, vector<64x1000xbf16>, vector<2x1000xf32> -> vector<2x1000xf32>
    %c0_6 = arith.constant 0 : index
    %c0_7 = arith.constant 0 : index
    %7 = vector.load %arg3[%c0_6, %c0_7] : memref<1x1000xf32, #tpu.memory_space<vmem>>, vector<1x1000xf32>
    %8 = vector.broadcast %7 : vector<1x1000xf32> to vector<2x1000xf32>
    %9 = arith.addf %6, %8 : vector<2x1000xf32>
    %cst_8 = arith.constant 0.000000e+00 : f32
    %10 = vector.broadcast %cst_8 : f32 to vector<2x1000xf32>
    %11 = arith.maximumf %9, %10 : vector<2x1000xf32>
    %12 = arith.truncf %11 : vector<2x1000xf32> to vector<2x1000xbf16>
    %c0_9 = arith.constant 0 : index
    %c0_10 = arith.constant 0 : index
    %13 = vector.load %arg4[%c0_9, %c0_10] : memref<1000x128xbf16, #tpu.memory_space<vmem>>, vector<1000x128xbf16>
    %cst_11 = arith.constant dense<0.000000e+00> : vector<2x128xf32>
    %14 = tpu.matmul %12, %13, %cst_11 {dimension_numbers = #tpu.dot_dimension_numbers<[1], [0], [0], [1], [0, 0, 1, 1], [], []>} : vector<2x1000xbf16>, vector<1000x128xbf16>, vector<2x128xf32> -> vector<2x128xf32>
    %c0_12 = arith.constant 0 : index
    %c0_13 = arith.constant 0 : index
    %15 = vector.load %arg5[%c0_12, %c0_13] : memref<1x128xf32, #tpu.memory_space<vmem>>, vector<1x128xf32>
    %16 = vector.broadcast %15 : vector<1x128xf32> to vector<2x128xf32>
    %17 = arith.addf %14, %16 : vector<2x128xf32>
    %c0_14 = arith.constant 0 : index
    %c0_15 = arith.constant 0 : index
    %18 = vector.load %arg6[%c0_14, %c0_15] : memref<2x128xf32, #tpu.memory_space<vmem>>, vector<2x128xf32>
    tpu.vector_store %arg6[%c0_14, %c0_15], %17 {strides = array<i32>} : memref<2x128xf32, #tpu.memory_space<vmem>>, vector<2x128xf32>,
    return
  }
  func.func @transform_0(%arg0: i32) -> (i32, i32, i32) {
    %c0_i32 = arith.constant 0 : i32
    %c0_i32_0 = arith.constant 0 : i32
    %c0_i32_1 = arith.constant 0 : i32
    return %arg0, %c0_i32, %c0_i32_0 : i32, i32, i32
  }
  func.func @transform_1(%arg0: i32) -> (i32, i32) {
    %c0_i32 = arith.constant 0 : i32
    %c0_i32_0 = arith.constant 0 : i32
    %c0_i32_1 = arith.constant 0 : i32
    return %c0_i32, %c0_i32_0 : i32, i32
  }
  func.func @transform_2(%arg0: i32) -> (i32, i32) {
    %c0_i32 = arith.constant 0 : i32
    %c0_i32_0 = arith.constant 0 : i32
    %c0_i32_1 = arith.constant 0 : i32
    return %c0_i32, %c0_i32_0 : i32, i32
  }
  func.func @transform_3(%arg0: i32) -> (i32, i32) {
    %c0_i32 = arith.constant 0 : i32
    %c0_i32_0 = arith.constant 0 : i32
    %c0_i32_1 = arith.constant 0 : i32
    return %c0_i32, %c0_i32_0 : i32, i32
  }
  func.func @transform_4(%arg0: i32) -> (i32, i32) {
    %c0_i32 = arith.constant 0 : i32
    %c0_i32_0 = arith.constant 0 : i32
    %c0_i32_1 = arith.constant 0 : i32
    return %c0_i32, %c0_i32_0 : i32, i32
  }
  func.func @transform_5(%arg0: i32) -> (i32, i32) {
    %c0_i32 = arith.constant 0 : i32
    %c0_i32_0 = arith.constant 0 : i32
    return %arg0, %c0_i32 : i32, i32
  }
}

</mosaic_0001>

<bundles_post_ra>
// kernel: tpu_custom_call.1
= control target key start
LH: loop header
LB: loop body
LE: loop exit
PB: predicated region body
PF: predicated region fallthrough
CT: control target
= control target key end

     0   :  { %10 = vsyncpa [#allocation3], 0  ;;  %s2021_s0 = inlined_call_operand.hbm [shape: f32[2,64,256], index: 0, kind: input, shape index: {}]   ;;  %s2022_s1 = inlined_call_operand.hbm [shape: bf16[64,1000], index: 1, kind: input, shape index: {}]   ;;  %s2023_s2 = inlined_call_operand.hbm [shape: f32[1,1000], index: 2, kind: input, shape index: {}]   ;;  %s2024_s3 = inlined_call_operand.hbm [shape: bf16[1000,128], index: 3, kind: input, shape index: {}]   ;;  %s2025_s4 = inlined_call_operand.vmem [shape: f32[1,128], index: 4, kind: input, shape index: {}]   ;;  %s2026_s5 = inlined_call_operand.hbm [shape: f32[2,128], index: 5, kind: output, shape index: {}]  }
   0x1   :  { %11 = vsyncpa [#allocation6], 0 }
   0x2   :  { %12 = vsyncpa [#allocation9], 0  ;;  %s31_s20 = sshll.u32 %s2022_s1, 4  ;;  %s32_s20 = int_to_ptr.hbm [resolvable:$true] %s31_s20 }
   0x3   :  { %13 = vsyncpa [#allocation4], 0  ;;  %s1859_s21 = smov [#allocation5]   ;;  %s18_s25 = sshll.u32 %s2021_s0, 4  ;;  %s19_s25 = int_to_ptr.hbm [resolvable:$true] %s18_s25 }
   0x4   :  { %s33_s22 = sshll.u32 %s1859_s21, 4  ;;  %s1860_s26 = smov 512   ;;  %s34_s22 = int_to_ptr.vmem [resolvable:$true] %s33_s22 }
   0x5   :  { %s1861_s27 = smov 32   ;;  %s1862_s28 = smov [#allocation2]  }
   0x6   :  { %39 = dma.hbm_to_vmem [thread:$0]  %s32_s20, 4096, %s34_s22, [#allocation6], %s1860_s26, %s1860_s26, %s1861_s27  }
   0x7   :  { %s20_s29 = sshll.u32 %s1862_s28, 4  ;;  %s1863_s30 = smov 256   ;;  %s21_s29 = int_to_ptr.vmem [resolvable:$true] %s20_s29 }
   0x8   :  { %s1864_s6 = smov 16   ;;  %s45_s8 = sshll.u32 %s2023_s2, 4  ;;  %s46_s8 = int_to_ptr.hbm [resolvable:$true] %s45_s8 }
   0x9   :  { %26 = dma.hbm_to_vmem [thread:$0]  %s19_s25, 4096, %s21_s29, [#allocation3], %s1863_s30, %s1863_s30, %s1864_s6  }
   0xa   :  { %s1865_s9 = smov [#allocation7]   ;;  %s55_s12 = sshll.u32 %s2024_s3, 4  ;;  %s56_s12 = int_to_ptr.hbm [resolvable:$true] %s55_s12 }
   0xb   :  { %s47_s10 = sshll.u32 %s1865_s9, 4  ;;  %s1866_s13 = smov [#allocation8]   ;;  %s48_s10 = int_to_ptr.vmem [resolvable:$true] %s47_s10 }
   0xc   :  { %50 = dma.hbm_to_vmem [thread:$0]  %s46_s8, 128, %s48_s10, [#allocation6]  }
   0xd   :  { %s57_s14 = sshll.u32 %s1866_s13, 4  ;;  %s1867_s15 = smov 64   ;;  %s58_s14 = int_to_ptr.vmem [resolvable:$true] %s57_s14 }
   0xe   :  { %s1868_s16 = smov 4  }
   0xf   :  { %63 = dma.hbm_to_vmem [thread:$0]  %s56_s12, 8000, %s58_s14, [#allocation9], %s1867_s15, %s1867_s15, %s1868_s16  }
  0x10   :  { %1851 = dma.done.wait [#allocation3], 4096  }
  0x11   :  { %1852 = vsyncadd [#allocation3], 4294963200 }
  0x12   :  { %1853 = dma.done.wait [#allocation6], 4224  }
  0x13   :  { %1854 = vsyncadd [#allocation6], 4294963072 }
  0x14   :  { %1855 = dma.done.wait [#allocation9], 8000  }
  0x15   :  { %1856 = vsyncadd [#allocation9], 4294959296  ;;  %v99_v0 = vld [vmem:[#allocation2 + $0x80] sm:$0xff]  ;;  %v100_v1 = vld [vmem:[#allocation2 + $0x88] sm:$0xff]  ;;  %v1869_v48 = vmov 256.0   ;;  %vm273_vm1 = vcmask 130112  }
  0x16   :  { %v87_v2 = vld [vmem:[#allocation2 + $0x20] sm:$0xff]  ;;  %v139_v3 = vadd.f32 %v100_v1, %v99_v0  ;;  %v88_v4 = vld [vmem:[#allocation2 + $0x28] sm:$0xff]  ;;  %v101_v9 = vld [vmem:[#allocation2 + $0x90] sm:$0xff]  ;;  %1729 = vrcp.f32 %v1869_v48  ;;  %vm277_vm2 = vcmask 195712   ;;  %vm281_vm3 = vcmask 261312   ;;  %s1870_s17 = smov [#allocation10]  }
  0x17   :  { %v83_v5 = vld [vmem:[#allocation2] sm:$0xff]  ;;  %v84_v6 = vld [vmem:[#allocation2 + $0x8] sm:$0xff]  ;;  %v121_v7 = vadd.f32 %v88_v4, %v87_v2  ;;  %v102_v10 = vld [vmem:[#allocation2 + $0x98] sm:$0xff]  ;;  %vm285_vm4 = vcmask 326912   ;;  %vm289_vm5 = vcmask 392512   ;;  %vm293_vm6 = vcmask 458112  }
  0x18   :  { %v115_v8 = vadd.f32 %v84_v6, %v83_v5  ;;  %140 = vadd.xlane.f32.xlu1 %v139_v3  ;;  %v89_v11 = vld [vmem:[#allocation2 + $0x30] sm:$0xff]  ;;  %v90_v12 = vld [vmem:[#allocation2 + $0x38] sm:$0xff]  ;;  %v142_v15 = vadd.f32 %v102_v10, %v101_v9  ;;  %v91_v20 = vld [vmem:[#allocation2 + $0x40] sm:$0xff]  ;;  %vm297_vm7 = vcmask 523712   ;;  %vm314_vm8 = vcmask 1041409   ;;  %s1225_s20 = sshll.u32 %s2026_s5, 4  ;;  %s1226_s20 = int_to_ptr.hbm [resolvable:$true] %s1225_s20 }
  0x19   :  { %122 = vadd.xlane.f32.xlu2 %v121_v7  ;;  %v85_v13 = vld [vmem:[#allocation2 + $0x10] sm:$0xff]  ;;  %v86_v14 = vld [vmem:[#allocation2 + $0x18] sm:$0xff]  ;;  %v124_v16 = vadd.f32 %v90_v12, %v89_v11  ;;  %v92_v21 = vld [vmem:[#allocation2 + $0x48] sm:$0xff]  ;;  %vm477_vm9 = vcmask 523264   ;;  %vm1109_vm10 = vcmask 1043456   ;;  %vm1105_vm11 = vcmask 850944  }
  0x1a   :  { %116 = vadd.xlane.f32.xlu0 %v115_v8  ;;  %v118_v17 = vadd.f32 %v86_v14, %v85_v13  ;;  %v105_v18 = vld [vmem:[#allocation2 + $0xb0] sm:$0xff]  ;;  %v106_v19 = vld [vmem:[#allocation2 + $0xb8] sm:$0xff]  ;;  %v103_v22 = vld [vmem:[#allocation2 + $0xa0] sm:$0xff]  ;;  %v127_v25 = vadd.f32 %v92_v21, %v91_v20 }
  0x1b   :  { %v104_v23 = vld [vmem:[#allocation2 + $0xa8] sm:$0xff]  ;;  %v148_v24 = vadd.f32 %v106_v19, %v105_v18  ;;  %v107_v27 = vld [vmem:[#allocation2 + $0xc0] sm:$0xff]  ;;  %v109_v29 = vld [vmem:[#allocation2 + $0xd0] sm:$0xff]  ;;  %v268_v18 = vlaneseq }
  0x1c   :  { %v145_v26 = vadd.f32 %v104_v23, %v103_v22  ;;  %v108_v28 = vld [vmem:[#allocation2 + $0xc8] sm:$0xff]  ;;  %v110_v30 = vld [vmem:[#allocation2 + $0xd8] sm:$0xff]  ;;  %v93_v31 = vld [vmem:[#allocation2 + $0x50] sm:$0xff]  ;;  %v1915_v50 = vpop.eup %1729 }
  0x1d   :  { %v94_v32 = vld [vmem:[#allocation2 + $0x58] sm:$0xff]  ;;  %v151_v33 = vadd.f32 %v108_v28, %v107_v27  ;;  %v154_v34 = vadd.f32 %v110_v30, %v109_v29  ;;  %v97_v36 = vld [vmem:[#allocation2 + $0x70] sm:$0xff]  ;;  %v95_v38 = vld [vmem:[#allocation2 + $0x60] sm:$0xff]  ;;  %v164_v53 = vmul.f32 256.0, %v1915_v50  ;;  %vm168_vm0 = vweird.f32 %v1915_v50 }
  0x1e   :  { %v130_v35 = vadd.f32 %v94_v32, %v93_v31  ;;  %v98_v37 = vld [vmem:[#allocation2 + $0x78] sm:$0xff]  ;;  %v96_v39 = vld [vmem:[#allocation2 + $0x68] sm:$0xff]  ;;  %v111_v40 = vld [vmem:[#allocation2 + $0xe0] sm:$0xff]  ;;  %v1928_v31 = vand.u32 127, %v268_v18 }
  0x1f   :  { %v112_v41 = vld [vmem:[#allocation2 + $0xe8] sm:$0xff]  ;;  %v136_v42 = vadd.f32 %v98_v37, %v97_v36  ;;  %v133_v43 = vadd.f32 %v96_v39, %v95_v38  ;;  %v113_v45 = vld [vmem:[#allocation2 + $0xf0] sm:$0xff]  ;;  %v114_v46 = vld [vmem:[#allocation2 + $0xf8] sm:$0xff]  ;;  %v165_v1 = vsub.f32 1.0, %v164_v53 }
  0x20   :  { %143 = vadd.xlane.f32.xlu1 %v142_v15  ;;  %v157_v44 = vadd.f32 %v112_v41, %v111_v40  ;;  %v160_v47 = vadd.f32 %v114_v46, %v113_v45  ;;  %v1335_v54 = vld [vmem:[#allocation5 + $0xc0] sm:$0xf]  ;;  %v1646_v56 = vld [vmem:[#allocation5 + $0xc4] sm:$0xf]  ;;  %v1343_v59 = vld [vmem:[#allocation5 + $0xc8] sm:$0xf] }
  0x21   :  { %125 = vadd.xlane.f32.xlu2 %v124_v16  ;;  %v1650_v55 = vld [vmem:[#allocation5 + $0xdc] sm:$0xf0]  ;;  %v1337_v58 = vld [vmem:[#allocation5 + $0xe0] sm:$0xf0]  ;;  %v1651_v60 = vld [vmem:[#allocation5 + $0xe4] sm:$0xf0] }
  0x22   :  { %119 = vadd.xlane.f32.xlu0 %v118_v17  ;;  %v1336_v57 = vor.u32 %v1650_v55, %v1335_v54  ;;  %v1340_v61 = vor.u32 %v1646_v56, %v1337_v58  ;;  %v1344_v62 = vor.u32 %v1651_v60, %v1343_v59  ;;  %v1647_v63 = vld [vmem:[#allocation5 + $0xcc] sm:$0xf]  ;;  %v1303_v6 = vld [vmem:[#allocation5 + $0x80] sm:$0xf]  ;;  %v1638_v8 = vld [vmem:[#allocation5 + $0x84] sm:$0xf]  ;;  %v166_v17 = vmul.f32 %v1915_v50, %v165_v1 }
  0x23   :  { %v1345_v0 = vld [vmem:[#allocation5 + $0xe8] sm:$0xf0]  ;;  %v1642_v7 = vld [vmem:[#allocation5 + $0x9c] sm:$0xf0]  ;;  %v1305_v10 = vld [vmem:[#allocation5 + $0xa0] sm:$0xf0] }
  0x24   :  { %485 = vmatpush.bf16.msra.mxu0 %v1336_v57  ;;  %v1348_v3 = vor.u32 %v1647_v63, %v1345_v0  ;;  %498 = vmatpush.bf16.msra.mxu1 %v1340_v61  ;;  %v1304_v9 = vor.u32 %v1642_v7, %v1303_v6  ;;  %v1311_v11 = vld [vmem:[#allocation5 + $0x88] sm:$0xf]  ;;  %v1308_v13 = vor.u32 %v1638_v8, %v1305_v10  ;;  %v1639_v15 = vld [vmem:[#allocation5 + $0x8c] sm:$0xf]  ;;  %v1271_v20 = vld [vmem:[#allocation5 + $0x40] sm:$0xf] }
  0x25   :  { %511 = vmatpush.bf16.msra.mxu2 %v1344_v62  ;;  %v1643_v12 = vld [vmem:[#allocation5 + $0xa4] sm:$0xf0]  ;;  %v1313_v16 = vld [vmem:[#allocation5 + $0xa8] sm:$0xf0]  ;;  %v1634_v21 = vld [vmem:[#allocation5 + $0x5c] sm:$0xf0]  ;;  %v167_v30 = vadd.f32 %v1915_v50, %v166_v17 }
  0x26   :  { %524 = vmatpush.bf16.msra.mxu3 %v1348_v3  ;;  %v1312_v14 = vor.u32 %v1643_v12, %v1311_v11  ;;  %v1316_v19 = vor.u32 %v1639_v15, %v1313_v16  ;;  %v1630_v22 = vld [vmem:[#allocation5 + $0x44] sm:$0xf]  ;;  %v1631_v28 = vld [vmem:[#allocation5 + $0x4c] sm:$0xf]  ;;  %v1239_v36 = vld [vmem:[#allocation5] sm:$0xf] }
  0x27   :  { %v1273_v23 = vld [vmem:[#allocation5 + $0x60] sm:$0xf0]  ;;  %v1281_v29 = vld [vmem:[#allocation5 + $0x68] sm:$0xf0]  ;;  %v1626_v37 = vld [vmem:[#allocation5 + $0x1c] sm:$0xf0]  ;;  %v1936_v48 = vsel %vm168_vm0, %v1915_v50, %v167_v30 }
  0x28   :  { %149 = vadd.xlane.f32.xlu1 %v148_v24  ;;  %486 = vmatpush.bf16.msra.mxu0 %v1304_v9  ;;  %v1279_v24 = vld [vmem:[#allocation5 + $0x48] sm:$0xf]  ;;  %v1276_v27 = vor.u32 %v1630_v22, %v1273_v23  ;;  %v1622_v38 = vld [vmem:[#allocation5 + $0x4] sm:$0xf]  ;;  %v1284_v39 = vor.u32 %v1631_v28, %v1281_v29  ;;  %v1623_v46 = vld [vmem:[#allocation5 + $0xc] sm:$0xf] }
  0x29   :  { %128 = vadd.xlane.f32.xlu2 %v127_v25  ;;  %499 = vmatpush.bf16.msra.mxu1 %v1308_v13  ;;  %v1635_v25 = vld [vmem:[#allocation5 + $0x64] sm:$0xf0]  ;;  %v1241_v40 = vld [vmem:[#allocation5 + $0x20] sm:$0xf0]  ;;  %v1939_v54 = vadd.s32 4294967288, %v1928_v31  ;;  %v1942_v55 = vadd.s32 4294967280, %v1928_v31 }
  0x2a   :  { %146 = vadd.xlane.f32.xlu0 %v145_v26  ;;  %512 = vmatpush.bf16.msra.mxu2 %v1312_v14  ;;  %v1272_v26 = vor.u32 %v1634_v21, %v1271_v20  ;;  %v1247_v41 = vld [vmem:[#allocation5 + $0x8] sm:$0xf]  ;;  %v1359_v57 = vld [vmem:[#allocation5 + $0xd8] sm:$0xf]  ;;  %v1649_v59 = vld [vmem:[#allocation5 + $0xdc] sm:$0xf] }
  0x2b   :  { %525 = vmatpush.bf16.msra.mxu3 %v1316_v19  ;;  %v1653_v58 = vld [vmem:[#allocation5 + $0xf4] sm:$0xf0]  ;;  %v1361_v63 = vld [vmem:[#allocation5 + $0xf8] sm:$0xf0]  ;;  %v1351_v0 = vld [vmem:[#allocation5 + $0xd0] sm:$0xf] }
  0x2c   :  { %487 = vmatpush.bf16.msra.mxu0 %v1272_v26  ;;  %v1360_v62 = vor.u32 %v1653_v58, %v1359_v57  ;;  %v1652_v1 = vld [vmem:[#allocation5 + $0xec] sm:$0xf0]  ;;  %v1648_v8 = vld [vmem:[#allocation5 + $0xd4] sm:$0xf]  ;;  %v1327_v9 = vld [vmem:[#allocation5 + $0x98] sm:$0xf] }
  0x2d   :  { %500 = vmatpush.bf16.msra.mxu1 %v1276_v27  ;;  %v1352_v7 = vor.u32 %v1652_v1, %v1351_v0  ;;  %v1641_v14 = vld [vmem:[#allocation5 + $0x9c] sm:$0xf]  ;;  %v1644_v16 = vld [vmem:[#allocation5 + $0xac] sm:$0xf0]  ;;  %v1640_v17 = vld [vmem:[#allocation5 + $0x94] sm:$0xf] }
  0x2e   :  { %v1329_v15 = vld [vmem:[#allocation5 + $0xb8] sm:$0xf0]  ;;  %v1321_v23 = vld [vmem:[#allocation5 + $0xb0] sm:$0xf0]  ;;  %v1255_v58 = vld [vmem:[#allocation5 + $0x10] sm:$0xf] }
  0x2f   :  { %526 = vmatpush.bf16.msra.mxu3 %v1284_v39  ;;  %v1332_v21 = vor.u32 %v1641_v14, %v1329_v15  ;;  %v1324_v29 = vor.u32 %v1640_v17, %v1321_v23  ;;  %v1633_v30 = vld [vmem:[#allocation5 + $0x5c] sm:$0xf]  ;;  %v1636_v39 = vld [vmem:[#allocation5 + $0x6c] sm:$0xf0]  ;;  %v1624_v0 = vld [vmem:[#allocation5 + $0x14] sm:$0xf] }
  0x30   :  { %152 = vadd.xlane.f32.xlu1 %v151_v33  ;;  %v1265_v57 = vld [vmem:[#allocation5 + $0x38] sm:$0xf0]  ;;  %v1257_v1 = vld [vmem:[#allocation5 + $0x30] sm:$0xf0] }
  0x31   :  { %155 = vadd.xlane.f32.xlu2 %v154_v34 }
  0x32   :  { %131 = vadd.xlane.f32.xlu0 %v130_v35  ;;  %v1280_v35 = vor.u32 %v1635_v25, %v1279_v24  ;;  %v1295_v24 = vld [vmem:[#allocation5 + $0x58] sm:$0xf] }
  0x33   :  { %v1637_v25 = vld [vmem:[#allocation5 + $0x74] sm:$0xf0] }
  0x34   :  { %513 = vmatpush.bf16.msra.mxu2 %v1280_v35 }
  0x38   :  { %137 = vadd.xlane.f32.xlu1 %v136_v42  ;;  %v1627_v42 = vld [vmem:[#allocation5 + $0x24] sm:$0xf0] }
  0x39   :  { %158 = vadd.xlane.f32.xlu2 %v157_v44  ;;  %v1244_v44 = vor.u32 %v1622_v38, %v1241_v40  ;;  %v1248_v45 = vor.u32 %v1627_v42, %v1247_v41  ;;  %v1296_v38 = vor.u32 %v1637_v25, %v1295_v24  ;;  %v1632_v40 = vld [vmem:[#allocation5 + $0x54] sm:$0xf]  ;;  %v1971_v42 = vadd.s32 4294967272, %v1928_v31 }
  0x3a   :  { %134 = vadd.xlane.f32.xlu0 %v133_v43  ;;  %v1240_v43 = vor.u32 %v1626_v37, %v1239_v36  ;;  %v1289_v41 = vld [vmem:[#allocation5 + $0x70] sm:$0xf0]  ;;  %v291_v24 = vadd.s32 4294967248, %v1928_v31 }
  0x3b   :  { %501 = vmatpush.bf16.msra.mxu1 %v1244_v44  ;;  %514 = vmatpush.bf16.msra.mxu2 %v1248_v45  ;;  %v1263_v45 = vld [vmem:[#allocation5 + $0x18] sm:$0xf] }
  0x3c   :  { %488 = vmatpush.bf16.msra.mxu0 %v1240_v43 }
  0x3f   :  { %563 = vmatpush.bf16.msrb.mxu2 %v1360_v62 }
  0x40   :  { %537 = vmatpush.bf16.msrb.mxu0 %v1352_v7 }
  0x42   :  { %161 = vadd.xlane.f32.xlu0 %v160_v47  ;;  %v1249_v47 = vld [vmem:[#allocation5 + $0x28] sm:$0xf0] }
  0x43   :  { %v1252_v53 = vor.u32 %v1623_v46, %v1249_v47  ;;  %v1629_v46 = vld [vmem:[#allocation5 + $0x34] sm:$0xf0] }
  0x44   :  { %v1264_v7 = vor.u32 %v1629_v46, %v1263_v45 }
  0x45   :  { %527 = vmatpush.bf16.msra.mxu3 %v1252_v53  ;;  %v1292_v53 = vor.u32 %v1632_v40, %v1289_v41 }
  0x8b   :  { %v1913_v49 = vpop.xlane.xlu1 %140 }
  0x8c   :  { %v1917_v51 = vpop.xlane.xlu2 %122  ;;  %v178_v60 = vmul.f32 %v1936_v48, %v1913_v49  ;;  %v1364_v49 = vor.u32 %v1649_v59, %v1361_v63  ;;  %v1628_v63 = vld [vmem:[#allocation5 + $0x2c] sm:$0xf0] }
  0x8d   :  { %v1919_v52 = vpop.xlane.xlu0 %116  ;;  %v172_v3 = vmul.f32 %v1936_v48, %v1917_v51  ;;  %v1645_v51 = vld [vmem:[#allocation5 + $0xb4] sm:$0xf0] }
  0x8e   :  { %v170_v50 = vmul.f32 %v1936_v48, %v1919_v52  ;;  %v1353_v52 = vld [vmem:[#allocation5 + $0xf0] sm:$0xf0]  ;;  %576 = vmatpush.bf16.msrb.mxu3 %v1364_v49  ;;  %v1328_v20 = vor.u32 %v1645_v51, %v1327_v9 }
  0x8f   :  { %v1356_v13 = vor.u32 %v1648_v8, %v1353_v52 }
  0x90   :  { %564 = vmatpush.bf16.msrb.mxu2 %v1328_v20 }
  0x91   :  { %550 = vmatpush.bf16.msrb.mxu1 %v1356_v13 }
  0x92   :  { %577 = vmatpush.bf16.msrb.mxu3 %v1332_v21 }
  0x93   :  { %v1922_v2 = vpop.xlane.xlu1 %143 }
  0x94   :  { %v1924_v4 = vpop.xlane.xlu2 %125  ;;  %v179_v61 = vmul.f32 %v1936_v48, %v1922_v2  ;;  %565 = vmatpush.bf16.msrb.mxu2 %v1296_v38 }
  0x95   :  { %v120_v5 = vpop.xlane.xlu0 %119  ;;  %551 = vmatpush.bf16.msrb.mxu1 %v1324_v29 }
  0x96   :  { %v171_v56 = vmul.f32 %v1936_v48, %v120_v5  ;;  %v173_v5 = vmul.f32 %v1936_v48, %v1924_v4  ;;  %v1319_v4 = vld [vmem:[#allocation5 + $0x90] sm:$0xf]  ;;  %v1959_v18 = vpack.c.bf16 %v179_v61, %v178_v60 }
  0x97   :  { %v1320_v22 = vor.u32 %v1644_v16, %v1319_v4 }
  0x98   :  { %v1955_v10 = vpack.c.bf16 %v171_v56, %v170_v50  ;;  %v1961_v26 = vpack.c.bf16 %v173_v5, %v172_v3  ;;  %v1625_v56 = vld [vmem:[#allocation5 + $0x1c] sm:$0xf]  ;;  %v260_v59 = vunpack.c.l.b16 %v1959_v18  ;;  %v261_v60 = vunpack.c.h.b16 %v1959_v18  ;;  %566 = vmatpush.bf16.msrb.mxu2 %v1264_v7 }
  0x99   :  { %538 = vmatpush.bf16.msrb.mxu0 %v1320_v22  ;;  %552 = vmatpush.bf16.msrb.mxu1 %v1292_v53  ;;  %v287_v22 = vadd.s32 4294967256, %v1928_v31  ;;  %v1684_v7 = vld [vmem:[#allocation8 + $0xf0] sm:$0xff] }
  0x9a   :  { %v252_v35 = vunpack.c.l.b16 %v1955_v10  ;;  %v253_v36 = vunpack.c.h.b16 %v1955_v10  ;;  %v254_v50 = vunpack.c.l.b16 %v1961_v26  ;;  %v1268_v10 = vor.u32 %v1625_v56, %v1265_v57 }
  0x9b   :  { %v150_v32 = vpop.xlane.xlu1 %149  ;;  %v255_v13 = vunpack.c.h.b16 %v1961_v26  ;;  %v299_v4 = vperm.slane %v260_v59, %v1928_v31  ;;  %v300_v16 = vperm.slane %v261_v60, %v1939_v54 }
  0x9c   :  { %v1931_v33 = vpop.xlane.xlu2 %128  ;;  %v181_v2 = vmul.f32 %v1936_v48, %v150_v32  ;;  %v1297_v32 = vld [vmem:[#allocation5 + $0x78] sm:$0xf0]  ;;  %v270_v3 = vperm.slane %v252_v35, %v1928_v31  ;;  %v272_v5 = vperm.slane %v253_v36, %v1939_v54  ;;  %v276_v51 = vperm.slane %v254_v50, %v1942_v55 }
  0x9d   :  { %v147_v34 = vpop.xlane.xlu0 %146  ;;  %v174_v27 = vmul.f32 %v1936_v48, %v1931_v33  ;;  %v1300_v44 = vor.u32 %v1633_v30, %v1297_v32 }
  0x9e   :  { %v180_v11 = vmul.f32 %v1936_v48, %v147_v34  ;;  %v1287_v34 = vld [vmem:[#allocation5 + $0x50] sm:$0xf]  ;;  %v274_v17 = vsel %vm273_vm1, %v272_v5, %v270_v3  ;;  %v1685_v3 = vld [vmem:[#allocation8 + $0xf8] sm:$0xff]  ;;  %v1660_v5 = vld [vmem:[#allocation8 + $0x30] sm:$0xff] }
  0x9f   :  { %v1288_v47 = vor.u32 %v1636_v39, %v1287_v34  ;;  %578 = vmatpush.bf16.msrb.mxu3 %v1300_v44  ;;  %v278_v54 = vsel %vm277_vm2, %v276_v51, %v274_v17  ;;  %v295_v39 = vadd.s32 4294967240, %v1928_v31  ;;  %v1657_v51 = vld [vmem:[#allocation8 + $0x18] sm:$0xff]  ;;  %v1664_v17 = vld [vmem:[#allocation8 + $0x50] sm:$0xff] }
  0xa0   :  { %v1968_v37 = vpack.c.bf16 %v181_v2, %v180_v11  ;;  %v283_v2 = vadd.s32 4294967264, %v1928_v31  ;;  %v1256_v11 = vor.u32 %v1628_v63, %v1255_v58  ;;  %v1661_v63 = vld [vmem:[#allocation8 + $0x38] sm:$0xff] }
  0xa1   :  { %539 = vmatpush.bf16.msrb.mxu0 %v1288_v47 }
  0xa2   :  { %v262_v8 = vunpack.c.l.b16 %v1968_v37  ;;  %v263_v18 = vunpack.c.h.b16 %v1968_v37 }
  0xa3   :  { %v153_v6 = vpop.xlane.xlu1 %152  ;;  %579 = vmatpush.bf16.msrb.mxu3 %v1268_v10  ;;  %v1683_v10 = vld [vmem:[#allocation8 + $0xe8] sm:$0xff] }
  0xa4   :  { %v156_v19 = vpop.xlane.xlu2 %155  ;;  %v182_v33 = vmul.f32 %v1936_v48, %v153_v6  ;;  %v302_v20 = vperm.slane %v262_v8, %v1942_v55  ;;  %v280_v55 = vperm.slane %v255_v13, %v1971_v42  ;;  %v304_v29 = vperm.slane %v263_v18, %v1971_v42  ;;  %v1659_v8 = vld [vmem:[#allocation8 + $0x28] sm:$0xff]  ;;  %v1682_v13 = vld [vmem:[#allocation8 + $0xe0] sm:$0xff]  ;;  %v1672_v18 = vld [vmem:[#allocation8 + $0x90] sm:$0xff] }
  0xa5   :  { %v132_v12 = vpop.xlane.xlu0 %131  ;;  %v183_v43 = vmul.f32 %v1936_v48, %v156_v19  ;;  %540 = vmatpush.bf16.msrb.mxu0 %v1256_v11  ;;  %v1666_v11 = vld [vmem:[#allocation8 + $0x60] sm:$0xff] }
  0xa6   :  { %v175_v28 = vmul.f32 %v1936_v48, %v132_v12  ;;  %v1260_v12 = vor.u32 %v1624_v0, %v1257_v1  ;;  %v282_v37 = vsel %vm281_vm3, %v280_v55, %v278_v54  ;;  %v1669_v0 = vld [vmem:[#allocation8 + $0x78] sm:$0xff]  ;;  %v1662_v54 = vld [vmem:[#allocation8 + $0x40] sm:$0xff]  ;;  %v1692_v55 = vld [vmem:[#allocation8 + $0x130] sm:$0xff] }
  0xa7   :  { %v192_v52 = vpack.c.bf16 %v183_v43, %v182_v33  ;;  %v1677_v1 = vld [vmem:[#allocation8 + $0xb8] sm:$0xff] }
  0xa8   :  { %v188_v61 = vpack.c.bf16 %v175_v28, %v174_v27  ;;  %553 = vmatpush.bf16.msrb.mxu1 %v1260_v12  ;;  %v301_v28 = vsel %vm273_vm1, %v300_v16, %v299_v4  ;;  %v1674_v12 = vld [vmem:[#allocation8 + $0xa0] sm:$0xff]  ;;  %v1681_v4 = vld [vmem:[#allocation8 + $0xd8] sm:$0xff]  ;;  %v1656_v16 = vld [vmem:[#allocation8 + $0x10] sm:$0xff] }
  0xa9   :  { %v264_v21 = vunpack.c.l.b16 %v192_v52  ;;  %v265_v30 = vunpack.c.h.b16 %v192_v52  ;;  %v303_v34 = vsel %vm277_vm2, %v302_v20, %v301_v28  ;;  %v1667_v52 = vld [vmem:[#allocation8 + $0x68] sm:$0xff]  ;;  %v1709_v28 = vld [vmem:[#allocation8 + $0x1b8] sm:$0xff] }
  0xaa   :  { %v256_v14 = vunpack.c.l.b16 %v188_v61  ;;  %v257_v23 = vunpack.c.h.b16 %v188_v61  ;;  %v305_v42 = vsel %vm281_vm3, %v304_v29, %v303_v34  ;;  %v1655_v20 = vld [vmem:[#allocation8 + $0x8] sm:$0xff]  ;;  %v1700_v29 = vld [vmem:[#allocation8 + $0x170] sm:$0xff] }
  0xab   :  { %v138_v62 = vpop.xlane.xlu1 %137  ;;  %v306_v35 = vperm.slane %v264_v21, %v283_v2  ;;  %v308_v44 = vperm.slane %v265_v30, %v287_v22  ;;  %v1663_v21 = vld [vmem:[#allocation8 + $0x48] sm:$0xff]  ;;  %v725_v30 = vld [vmem:[#allocation8 + $0x1f0] sm:$0xf] }
  0xac   :  { %v177_v6 = vmul.f32 %v1936_v48, %v138_v62  ;;  %v159_v19 = vpop.xlane.xlu2 %158  ;;  %v284_v25 = vperm.slane %v256_v14, %v283_v2  ;;  %v288_v38 = vperm.slane %v257_v23, %v287_v22  ;;  %v1658_v2 = vld [vmem:[#allocation8 + $0x20] sm:$0xff]  ;;  %v1665_v14 = vld [vmem:[#allocation8 + $0x58] sm:$0xff]  ;;  %v1671_v22 = vld [vmem:[#allocation8 + $0x88] sm:$0xff] }
  0xad   :  { %v135_v49 = vpop.xlane.xlu0 %134  ;;  %v184_v27 = vmul.f32 %v1936_v48, %v159_v19  ;;  %v307_v45 = vsel %vm285_vm4, %v306_v35, %v305_v42  ;;  %v1680_v19 = vld [vmem:[#allocation8 + $0xd0] sm:$0xff]  ;;  %v1679_v23 = vld [vmem:[#allocation8 + $0xc8] sm:$0xff]  ;;  %v1689_v42 = vld [vmem:[#allocation8 + $0x118] sm:$0xff] }
  0xae   :  { %v176_v9 = vmul.f32 %v1936_v48, %v135_v49  ;;  %v286_v41 = vsel %vm285_vm4, %v284_v25, %v282_v37  ;;  %v309_v58 = vsel %vm289_vm5, %v308_v44, %v307_v45  ;;  %v1676_v49 = vld [vmem:[#allocation8 + $0xb0] sm:$0xff]  ;;  %v1693_v25 = vld [vmem:[#allocation8 + $0x138] sm:$0xff]  ;;  %v1691_v34 = vld [vmem:[#allocation8 + $0x128] sm:$0xff] }
  0xaf   :  { %v1699_v35 = vld [vmem:[#allocation8 + $0x168] sm:$0xff]  ;;  %v1697_v44 = vld [vmem:[#allocation8 + $0x158] sm:$0xff]  ;;  %v1706_v45 = vld [vmem:[#allocation8 + $0x1a0] sm:$0xff] }
  0xb0   :  { %v189_v15 = vpack.c.bf16 %v177_v6, %v176_v9  ;;  %v1668_v6 = vld [vmem:[#allocation8 + $0x70] sm:$0xff]  ;;  %v1675_v9 = vld [vmem:[#allocation8 + $0xa8] sm:$0xff] }
  0xb2   :  { %v258_v26 = vunpack.c.l.b16 %v189_v15  ;;  %v259_v40 = vunpack.c.h.b16 %v189_v15  ;;  %v1673_v15 = vld [vmem:[#allocation8 + $0x98] sm:$0xff] }
  0xb4   :  { %v292_v33 = vperm.slane %v258_v26, %v291_v24  ;;  %v296_v53 = vperm.slane %v259_v40, %v295_v39  ;;  %v1701_v26 = vld [vmem:[#allocation8 + $0x178] sm:$0xff]  ;;  %v1690_v40 = vld [vmem:[#allocation8 + $0x120] sm:$0xff] }
  0xb5   :  { %v162_v32 = vpop.xlane.xlu0 %161 }
  0xb6   :  { %v185_v36 = vmul.f32 %v1936_v48, %v162_v32  ;;  %v290_v48 = vsel %vm289_vm5, %v288_v38, %v286_v41  ;;  %v979_v32 = vunpack.c.l.b16 %v725_v30  ;;  %v1708_v38 = vld [vmem:[#allocation8 + $0x1b0] sm:$0xff]  ;;  %v1698_v41 = vld [vmem:[#allocation8 + $0x160] sm:$0xff] }
  0xb7   :  { %v294_v56 = vsel %vm293_vm6, %v292_v33, %v290_v48  ;;  %v1707_v33 = vld [vmem:[#allocation8 + $0x1a8] sm:$0xff]  ;;  %v1696_v48 = vld [vmem:[#allocation8 + $0x150] sm:$0xff] }
  0xb8   :  { %v193_v43 = vpack.c.bf16 %v185_v36, %v184_v27  ;;  %v298_v60 = vsel %vm297_vm7, %v296_v53, %v294_v56  ;;  %v1670_v27 = vld [vmem:[#allocation8 + $0x80] sm:$0xff]  ;;  %v1042_v37 = vpack.c.b16 %v979_v32, %v979_v32  ;;  %v1705_v53 = vld [vmem:[#allocation8 + $0x198] sm:$0xff] }
  0xb9   :  { %v1678_v36 = vld [vmem:[#allocation8 + $0xc0] sm:$0xff]  ;;  %v1713_v56 = vld [vmem:[#allocation8 + $0x1d8] sm:$0xff] }
  0xba   :  { %v266_v46 = vunpack.c.l.b16 %v193_v43  ;;  %v267_v47 = vunpack.c.h.b16 %v193_v43  ;;  %v1715_v43 = vld [vmem:[#allocation8 + $0x1e8] sm:$0xff] }
  0xbc   :  { %v310_v31 = vperm.slane %v266_v46, %v291_v24  ;;  %v312_v57 = vperm.slane %v267_v47, %v295_v39  ;;  %v1654_v24 = vld [vmem:[#allocation8] sm:$0xff]  ;;  %v1111_v39 = vsel %vm1109_vm10, %v1042_v37, 0  ;;  %v1688_v47 = vld [vmem:[#allocation8 + $0x110] sm:$0xff] }
  0xbd   :  { %v1714_v46 = vld [vmem:[#allocation8 + $0x1e0] sm:$0xff] }
  0xbe   :  { %v311_v59 = vsel %vm293_vm6, %v310_v31, %v309_v58  ;;  %v1687_v31 = vld [vmem:[#allocation8 + $0x108] sm:$0xff]  ;;  %v1704_v58 = vld [vmem:[#allocation8 + $0x190] sm:$0xff] }
  0xbf   :  { %v313_v50 = vsel %vm297_vm7, %v312_v57, %v311_v59  ;;  %v1695_v57 = vld [vmem:[#allocation8 + $0x148] sm:$0xff]  ;;  %v1712_v59 = vld [vmem:[#allocation8 + $0x1d0] sm:$0xff] }
  0xc0   :  { %v315_v61 = vsel %vm314_vm8, %v313_v50, %v298_v60  ;;  %v1686_v60 = vld [vmem:[#allocation8 + $0x100] sm:$0xff] }
  0xc1   :  { %v316_v62 = vpack.c.b16 %v315_v61, %v315_v61  ;;  %v1694_v50 = vld [vmem:[#allocation8 + $0x140] sm:$0xff]  ;;  %v1703_v61 = vld [vmem:[#allocation8 + $0x188] sm:$0xff] }
  0xc3   :  { %1365 = vmatmul.msk.bf16.vlgmr.msra.gmra.mxu0 %vm477_vm9, %v316_v62  ;;  %1366 = vmatmul.msk.bf16.vlgmr.msra.gmra.mxu1 %vm477_vm9, %v316_v62 }
  0xc4   :  { %1367 = vmatmul.msk.bf16.vlgmr.msra.gmra.mxu2 %vm477_vm9, %v316_v62  ;;  %1368 = vmatmul.msk.bf16.vlgmr.msra.gmra.mxu3 %vm477_vm9, %v316_v62 }
  0xc5   :  { %1113 = vmatpush.bf16.msra.mxu0 %v1661_v63  ;;  %1126 = vmatpush.bf16.msra.mxu1 %v1669_v0  ;;  %v1702_v63 = vld [vmem:[#allocation8 + $0x180] sm:$0xff] }
  0xc6   :  { %1139 = vmatpush.bf16.msra.mxu2 %v1677_v1  ;;  %1152 = vmatpush.bf16.msra.mxu3 %v1685_v3  ;;  %v1710_v0 = vld [vmem:[#allocation8 + $0x1c0] sm:$0xff]  ;;  %v226_v1 = vld [vmem:[#allocation7] sm:$0xff] }
  0xc7   :  { %v228_v3 = vperm.slane %v226_v1, 0  ;;  %v235_v30 = vperm.slane %v226_v1, 7 }
  0xc9   :  { %1114 = vmatpush.bf16.msra.mxu0 %v1660_v5  ;;  %1127 = vmatpush.bf16.msra.mxu1 %v1668_v6  ;;  %v229_v5 = vperm.slane %v226_v1, 1 }
  0xca   :  { %1140 = vmatpush.bf16.msra.mxu2 %v1676_v49  ;;  %1153 = vmatpush.bf16.msra.mxu3 %v1684_v7 }
  0xcd   :  { %1115 = vmatpush.bf16.msra.mxu0 %v1659_v8  ;;  %1128 = vmatpush.bf16.msra.mxu1 %v1667_v52 }
  0xce   :  { %1141 = vmatpush.bf16.msra.mxu2 %v1675_v9  ;;  %1154 = vmatpush.bf16.msra.mxu3 %v1683_v10  ;;  %v230_v10 = vperm.slane %v226_v1, 2 }
  0xd1   :  { %1116 = vmatpush.bf16.msra.mxu0 %v1658_v2  ;;  %1129 = vmatpush.bf16.msra.mxu1 %v1666_v11  ;;  %v231_v2 = vperm.slane %v226_v1, 3 }
  0xd2   :  { %1142 = vmatpush.bf16.msra.mxu2 %v1674_v12  ;;  %1155 = vmatpush.bf16.msra.mxu3 %v1682_v13 }
  0xd3   :  { %1369 = vmatmul.msk.bf16.vlgmr.msrb.gmra.mxu0 %vm477_vm9, %v316_v62  ;;  %1370 = vmatmul.msk.bf16.vlgmr.msrb.gmra.mxu1 %vm477_vm9, %v316_v62 }
  0xd4   :  { %1371 = vmatmul.msk.bf16.vlgmr.msrb.gmra.mxu2 %vm477_vm9, %v316_v62  ;;  %1372 = vmatmul.msk.bf16.vlgmr.msrb.gmra.mxu3 %vm477_vm9, %v316_v62  ;;  %v1711_v62 = vld [vmem:[#allocation8 + $0x1c8] sm:$0xff] }
  0xd5   :  { %1117 = vmatpush.bf16.msra.mxu0 %v1657_v51  ;;  %1130 = vmatpush.bf16.msra.mxu1 %v1665_v14 }
  0xd6   :  { %1143 = vmatpush.bf16.msra.mxu2 %v1673_v15  ;;  %1156 = vmatpush.bf16.msra.mxu3 %v1681_v4 }
  0xd9   :  { %1118 = vmatpush.bf16.msra.mxu0 %v1656_v16  ;;  %1131 = vmatpush.bf16.msra.mxu1 %v1664_v17 }
  0xda   :  { %1144 = vmatpush.bf16.msra.mxu2 %v1672_v18  ;;  %1157 = vmatpush.bf16.msra.mxu3 %v1680_v19 }
  0xdd   :  { %1119 = vmatpush.bf16.msra.mxu0 %v1655_v20  ;;  %1132 = vmatpush.bf16.msra.mxu1 %v1663_v21  ;;  %v232_v21 = vperm.slane %v226_v1, 4 }
  0xde   :  { %1145 = vmatpush.bf16.msra.mxu2 %v1671_v22  ;;  %1158 = vmatpush.bf16.msra.mxu3 %v1679_v23  ;;  %v233_v22 = vperm.slane %v226_v1, 5 }
  0xe1   :  { %1120 = vmatpush.bf16.msra.mxu0 %v1654_v24  ;;  %1133 = vmatpush.bf16.msra.mxu1 %v1662_v54 }
  0xe2   :  { %1146 = vmatpush.bf16.msra.mxu2 %v1670_v27  ;;  %1159 = vmatpush.bf16.msra.mxu3 %v1678_v36 }
  0xe5   :  { %1165 = vmatpush.bf16.msrb.mxu0 %v1693_v25  ;;  %1178 = vmatpush.bf16.msrb.mxu1 %v1701_v26 }
  0xe6   :  { %1191 = vmatpush.bf16.msrb.mxu2 %v1709_v28  ;;  %1205 = vmatpush.bf16.msrb.mxu3 %v1111_v39 }
  0xe9   :  { %1166 = vmatpush.bf16.msrb.mxu0 %v1692_v55  ;;  %1179 = vmatpush.bf16.msrb.mxu1 %v1700_v29  ;;  %v234_v29 = vperm.slane %v226_v1, 6 }
  0xea   :  { %1192 = vmatpush.bf16.msrb.mxu2 %v1708_v38  ;;  %1206 = vmatpush.bf16.msrb.mxu3 %v1715_v43 }
  0xed   :  { %1167 = vmatpush.bf16.msrb.mxu0 %v1691_v34  ;;  %1180 = vmatpush.bf16.msrb.mxu1 %v1699_v35 }
  0xee   :  { %1193 = vmatpush.bf16.msrb.mxu2 %v1707_v33  ;;  %1207 = vmatpush.bf16.msrb.mxu3 %v1714_v46 }
  0xf1   :  { %1168 = vmatpush.bf16.msrb.mxu0 %v1690_v40  ;;  %1181 = vmatpush.bf16.msrb.mxu1 %v1698_v41 }
  0xf2   :  { %1194 = vmatpush.bf16.msrb.mxu2 %v1706_v45  ;;  %1208 = vmatpush.bf16.msrb.mxu3 %v1713_v56 }
  0xf5   :  { %1169 = vmatpush.bf16.msrb.mxu0 %v1689_v42  ;;  %1182 = vmatpush.bf16.msrb.mxu1 %v1697_v44 }
  0xf6   :  { %1195 = vmatpush.bf16.msrb.mxu2 %v1705_v53  ;;  %1209 = vmatpush.bf16.msrb.mxu3 %v1712_v59 }
  0xf9   :  { %1170 = vmatpush.bf16.msrb.mxu0 %v1688_v47  ;;  %1183 = vmatpush.bf16.msrb.mxu1 %v1696_v48  ;;  %v1728_v48 = vld [vmem:[%s2025_s4] ss:$0 sm:$0xff]  ;;  %s1223_s4 = sshll.u32 %s1870_s17, 4  ;;  %s1224_s4 = int_to_ptr.vmem [resolvable:$true] %s1223_s4 }
  0xfa   :  { %1196 = vmatpush.bf16.msrb.mxu2 %v1704_v58  ;;  %1210 = vmatpush.bf16.msrb.mxu3 %v1711_v62 }
  0xfd   :  { %1171 = vmatpush.bf16.msrb.mxu0 %v1687_v31  ;;  %1184 = vmatpush.bf16.msrb.mxu1 %v1695_v57 }
  0xfe   :  { %1197 = vmatpush.bf16.msrb.mxu2 %v1703_v61  ;;  %1211 = vmatpush.bf16.msrb.mxu3 %v1710_v0 }
 0x101   :  { %1172 = vmatpush.bf16.msrb.mxu0 %v1686_v60  ;;  %1185 = vmatpush.bf16.msrb.mxu1 %v1694_v50 }
 0x102   :  { %1198 = vmatpush.bf16.msrb.mxu2 %v1702_v63 }
 0x140   :  { %v490_v6 = vpop.f32.mrf.mxu0  ;;  %v503_v49 = vpop.f32.mrf.mxu1 }
 0x141   :  { %v491_v7 = vadd.f32 %v490_v6, %v228_v3  ;;  %v504_v8 = vadd.f32 %v503_v49, %v229_v5 }
 0x143   :  { %v585_v52 = vmax.f32 %v491_v7, 0.0  ;;  %v586_v9 = vmax.f32 %v504_v8, 0.0 }
 0x145   :  { %v593_v11 = vpack.c.bf16 %v585_v52, %v585_v52  ;;  %v594_v12 = vpack.c.bf16 %v586_v9, %v586_v9 }
 0x147   :  { %v516_v13 = vpop.f32.mrf.mxu2  ;;  %v529_v51 = vpop.f32.mrf.mxu3  ;;  %1121 = vmatmul.bf16.vlgmr.msra.gmra.mxu0 %v593_v11  ;;  %1134 = vmatmul.bf16.vlgmr.msra.gmra.mxu1 %v594_v12 }
 0x148   :  { %v517_v14 = vadd.f32 %v516_v13, %v230_v10  ;;  %v530_v15 = vadd.f32 %v529_v51, %v231_v2  ;;  %v492_v4 = vpop.f32.mrf.mxu0  ;;  %v505_v16 = vpop.f32.mrf.mxu1 }
 0x14a   :  { %v587_v17 = vmax.f32 %v517_v14, 0.0  ;;  %v588_v18 = vmax.f32 %v530_v15, 0.0 }
 0x14c   :  { %v595_v19 = vpack.c.bf16 %v587_v17, %v587_v17  ;;  %v596_v20 = vpack.c.bf16 %v588_v18, %v588_v18 }
 0x14e   :  { %1147 = vmatmul.bf16.vlgmr.msra.gmra.mxu2 %v595_v19  ;;  %1160 = vmatmul.bf16.vlgmr.msra.gmra.mxu3 %v596_v20 }
 0x14f   :  { %v518_v23 = vpop.f32.mrf.mxu2  ;;  %v531_v24 = vpop.f32.mrf.mxu3 }
 0x150   :  { %v542_v54 = vpop.f32.mrf.mxu0  ;;  %v555_v25 = vpop.f32.mrf.mxu1 }
 0x151   :  { %v543_v26 = vadd.f32 %v542_v54, %v232_v21  ;;  %v556_v27 = vadd.f32 %v555_v25, %v233_v22 }
 0x153   :  { %v589_v28 = vmax.f32 %v543_v26, 0.0  ;;  %v590_v55 = vmax.f32 %v556_v27, 0.0 }
 0x155   :  { %v597_v32 = vpack.c.bf16 %v589_v28, %v589_v28  ;;  %v598_v34 = vpack.c.bf16 %v590_v55, %v590_v55 }
 0x157   :  { %v568_v35 = vpop.f32.mrf.mxu2  ;;  %v581_v36 = vpop.f32.mrf.mxu3  ;;  %1173 = vmatmul.bf16.vlgmr.msrb.gmra.mxu0 %v597_v32  ;;  %1186 = vmatmul.bf16.vlgmr.msrb.gmra.mxu1 %v598_v34 }
 0x158   :  { %v569_v37 = vadd.f32 %v568_v35, %v234_v29  ;;  %v582_v38 = vadd.f32 %v581_v36, %v235_v30  ;;  %v544_v39 = vpop.f32.mrf.mxu0  ;;  %v557_v40 = vpop.f32.mrf.mxu1 }
 0x15a   :  { %v591_v41 = vmax.f32 %v569_v37, 0.0  ;;  %v592_v33 = vmax.f32 %v582_v38, 0.0 }
 0x15c   :  { %v599_v43 = vpack.c.bf16 %v591_v41, %v591_v41  ;;  %v600_v42 = vpack.c.bf16 %v592_v33, %v592_v33 }
 0x15e   :  { %1199 = vmatmul.bf16.vlgmr.msrb.gmra.mxu2 %v599_v43  ;;  %1621 = vmatmul.msk.bf16.vlgmr.msrb.gmra.mxu3 %vm1105_vm11, %v600_v42 }
 0x15f   :  { %v570_v44 = vpop.f32.mrf.mxu2  ;;  %v583_v45 = vpop.f32.mrf.mxu3 }
 0x1c4   :  { %v1122_v46 = vpop.f32.mrf.mxu0  ;;  %v1135_v47 = vpop.f32.mrf.mxu1 }
 0x1c5   :  { %v1123_v31 = vadd.f32 %v1728_v48, %v1122_v46 }
 0x1c7   :  { %v1136_v59 = vadd.f32 %v1135_v47, %v1123_v31 }
 0x1cc   :  { %v1124_v53 = vpop.f32.mrf.mxu0  ;;  %v1137_v56 = vpop.f32.mrf.mxu1 }
 0x1d1   :  { %v1148_v57 = vpop.f32.mrf.mxu2  ;;  %v1161_v58 = vpop.f32.mrf.mxu3 }
 0x1d2   :  { %v1149_v60 = vadd.f32 %v1148_v57, %v1136_v59 }
 0x1d4   :  { %v1174_v50 = vpop.f32.mrf.mxu0  ;;  %v1187_v61 = vpop.f32.mrf.mxu1  ;;  %v1162_v62 = vadd.f32 %v1161_v58, %v1149_v60 }
 0x1d6   :  { %v1175_v1 = vadd.f32 %v1174_v50, %v1162_v62 }
 0x1d8   :  { %v1188_v6 = vadd.f32 %v1187_v61, %v1175_v1 }
 0x1d9   :  { %v1150_v63 = vpop.f32.mrf.mxu2  ;;  %v1163_v0 = vpop.f32.mrf.mxu3 }
 0x1dc   :  { %v1176_v3 = vpop.f32.mrf.mxu0  ;;  %v1189_v5 = vpop.f32.mrf.mxu1 }
 0x1e1   :  { %v1200_v49 = vpop.f32.mrf.mxu2  ;;  %v1213_v7 = vpop.f32.mrf.mxu3 }
 0x1e2   :  { %v1201_v8 = vadd.f32 %v1200_v49, %v1188_v6 }
 0x1e4   :  { %v1214_v52 = vadd.f32 %v1213_v7, %v1201_v8 }
 0x1e6   :  { %1217 = vst [vmem:[#allocation10] sm:$0x3] %v1214_v52 }
 0x1e7   :  { %1228 = dma.vmem_to_hbm [thread:$0]  %s1224_s4, 32, %s1226_s20, [#allocation4]  }
 0x1e9   :  { %v1202_v9 = vpop.f32.mrf.mxu2  ;;  %v1215_v10 = vpop.f32.mrf.mxu3 }
 0x1ea   :  { %1857 = dma.done.wait [#allocation4], 32  }
 0x1eb   :  { %1858 = vsyncadd [#allocation4], 4294967264 }
 0x1ec   :  { %1233 = vsyncpa [#allocation3], 1 }
 0x1ed   :  { %1234 = vsyncpa [#allocation6], 1 }
 0x1ee   :  { %1235 = vsyncpa [#allocation9], 1 }
 0x1ef   :  { %1236 = vsyncpa [#allocation4], 1 }

</bundles_post_ra>
